<compile_context>
chip_gen: v5e
topology: v5e:2x2
jax: 0.10.0
libtpu: 0.0.40
codegen_flags: <defaults>
</compile_context>

<pallas_src>
import functools

import jax
import jax.numpy as jnp
from jax.experimental import pallas as pl
from jax.experimental.pallas import tpu as pltpu

# Conv hyper-parameters (match torch.nn.Conv2d(3, 5, 6, stride=8, padding=10))
CIN, COUT = 3, 5
KH = KW = 6
STRIDE = 8
PAD = 10
SUB_CONST = 9.1

# GEMM dims, padded to MXU/vreg-friendly shapes.
K = CIN * KH * KW      # 108 (contraction dim) -> padded to 128 lanes/sublanes
K_PAD = 128
COUT_PAD = 8           # COUT 5 -> 8 (sublane alignment of the output rows)
M_ALIGN = 128          # M (= N*OH*OW) is the lane axis of the output -> 128


def conv_matmul_kernel(w_ref, p_ref, b_ref, o_ref):
    """Fused flipped GEMM: out.T = W @ patches.T + (bias - 9.1).

    w_ref: [COUT_PAD, K_PAD]   zero-padded weight, K ordered as (C, KH, KW)
    p_ref: [K_PAD, M_PAD]      zero-padded im2col patches, transposed
    b_ref: [COUT_PAD, 1]       bias with the -9.1 constant pre-folded
    o_ref: [COUT_PAD, M_PAD]
    """
    o_ref[...] = jnp.dot(w_ref[...], p_ref[...],
                         preferred_element_type=jnp.float32) + b_ref[...]


def _im2col_transposed(x_nchw):
    """Gather-free im2col producing [K, M] (valid because STRIDE >= KH, KW).

    After padding, output position oh reads rows oh*S .. oh*S+KH-1, i.e. the
    first KH taps of the oh-th stride window, so patches are built with
    pad + reshape + static slice + transpose only (no advanced indexing).
    Returns zero-padded [K_PAD, M_pad] patches and (n, oh, ow, m).
    """
    assert KH <= STRIDE and KW <= STRIDE
    n, c, h, w = x_nchw.shape
    oh = (h + 2 * PAD - KH) // STRIDE + 1
    ow = (w + 2 * PAD - KW) // STRIDE + 1
    hp, wp = oh * STRIDE, ow * STRIDE
    pad_h_hi = PAD + max(0, hp - (h + 2 * PAD))
    pad_w_hi = PAD + max(0, wp - (w + 2 * PAD))
    x_pad = jnp.pad(x_nchw, ((0, 0), (0, 0), (PAD, pad_h_hi), (PAD, pad_w_hi)))
    x_pad = x_pad[:, :, :hp, :wp]
    # (N, C, OH, S, OW, S) -> keep the first KH / KW taps of each window.
    x_r = x_pad.reshape(n, c, oh, STRIDE, ow, STRIDE)[:, :, :, :KH, :, :KW]
    # -> (C, KH, KW, N, OH, OW) -> (K, M): K on sublanes, M on lanes.
    m = n * oh * ow
    patches_t = jnp.transpose(x_r, (1, 3, 5, 0, 2, 4)).reshape(K, m)
    m_pad = ((m + M_ALIGN - 1) // M_ALIGN) * M_ALIGN
    patches_t = jnp.pad(patches_t, ((0, K_PAD - K), (0, m_pad - m)))
    return patches_t, (n, oh, ow, m)


def prepare_params(weight, bias):
    """One-time parameter preprocessing (hoisted out of the per-call path).

    weight: [COUT, CIN, KH, KW] -> [COUT_PAD, K_PAD] with K ordered (C,KH,KW)
    bias:   [COUT]              -> [COUT_PAD, 1] with the -9.1 folded in
    """
    w_pad = jnp.pad(weight.reshape(COUT, K).astype(jnp.float32),
                    ((0, COUT_PAD - COUT), (0, K_PAD - K)))
    b_fused = bias.astype(jnp.float32) - jnp.float32(SUB_CONST)
    b_pad = jnp.pad(b_fused, (0, COUT_PAD - COUT)).reshape(COUT_PAD, 1)
    return w_pad, b_pad


@jax.jit
def model_forward(x_nchw, w_pad, b_pad):
    """x_nchw: [N, CIN, H, W]; w_pad: [8, 128]; b_pad: [8, 1] -> NCHW out."""
    x_nchw = x_nchw.astype(jnp.float32)
    patches_t, (n, oh, ow, m) = _im2col_transposed(x_nchw)
    m_pad = patches_t.shape[1]

    # Single kernel invocation: no grid, no pipelining scaffolding — full
    # arrays land in VMEM once (total footprint well under 1 MiB).
    out_t = pl.pallas_call(
        conv_matmul_kernel,
        out_shape=jax.ShapeDtypeStruct((COUT_PAD, m_pad), jnp.float32),
        in_specs=[
            pl.BlockSpec(memory_space=pltpu.MemorySpace.VMEM),
            pl.BlockSpec(memory_space=pltpu.MemorySpace.VMEM),
            pl.BlockSpec(memory_space=pltpu.MemorySpace.VMEM),
        ],
        out_specs=pl.BlockSpec(memory_space=pltpu.MemorySpace.VMEM),
    )(w_pad, patches_t, b_pad)

    # [8, M_pad] -> [COUT, M] -> (COUT, N, OH, OW) -> NCHW (N, COUT, OH, OW)
    out = out_t[:COUT, :m].reshape(COUT, n, oh, ow)
    return jnp.transpose(out, (1, 0, 2, 3))


if __name__ == "__main__":
    key = jax.random.PRNGKey(0)
    kx, kw, kb = jax.random.split(key, 3)

    # Input consistent with the module: N=2, C=3, H=W=20.
    x = jax.random.normal(kx, (2, 3, 20, 20), dtype=jnp.float32)

    # Deterministic parameter init (same shapes as nn.Conv2d(3, 5, 6)).
    fan_in = CIN * KH * KW
    bound = 1.0 / (fan_in ** 0.5)
    weight = jax.random.uniform(kw, (COUT, CIN, KH, KW),
                                minval=-bound, maxval=bound,
                                dtype=jnp.float32)
    bias = jax.random.uniform(kb, (COUT,),
                              minval=-bound, maxval=bound,
                              dtype=jnp.float32)

    # Parameter padding done once, outside the per-call (jitted) path.
    w_pad, b_pad = prepare_params(weight, bias)

    out = jax.block_until_ready(model_forward(x, w_pad, b_pad))
    assert out.shape == (2, 5, 5, 5), out.shape

    # Cross-check against a plain-JAX reference convolution.
    ref = jax.lax.conv_general_dilated(
        x, weight, window_strides=(STRIDE, STRIDE),
        padding=((PAD, PAD), (PAD, PAD)),
        dimension_numbers=("NCHW", "OIHW", "NCHW"),
    ) + bias[None, :, None, None] - SUB_CONST
    assert jnp.allclose(out, ref, atol=1e-4, rtol=1e-4), (
        float(jnp.max(jnp.abs(out - ref))))

    print("KERNEL_OK")
</pallas_src>

<mosaic_0001>
module attributes {stable_mosaic.version = 11 : i64} {
  func.func @conv_matmul_kernel(%arg0: memref<8x128xf32, #tpu.memory_space<vmem>>, %arg1: memref<128x128xf32, #tpu.memory_space<vmem>>, %arg2: memref<8x1xf32, #tpu.memory_space<vmem>>, %arg3: memref<8x128xf32, #tpu.memory_space<vmem>>) attributes {dimension_semantics = [], scalar_prefetch = 0 : i64, scratch_operands = 0 : i64, tpu.core_type = #tpu.core_type<tc>} {
    %c0 = arith.constant 0 : index
    %c0_0 = arith.constant 0 : index
    %0 = vector.load %arg0[%c0, %c0_0] : memref<8x128xf32, #tpu.memory_space<vmem>>, vector<8x128xf32>
    %c0_1 = arith.constant 0 : index
    %c0_2 = arith.constant 0 : index
    %1 = vector.load %arg1[%c0_1, %c0_2] : memref<128x128xf32, #tpu.memory_space<vmem>>, vector<128x128xf32>
    %cst = arith.constant dense<0.000000e+00> : vector<8x128xf32>
    %2 = tpu.matmul %0, %1, %cst {dimension_numbers = #tpu.dot_dimension_numbers<[1], [0], [0], [1], [0, 0, 1, 1], [], []>} : vector<8x128xf32>, vector<128x128xf32>, vector<8x128xf32> -> vector<8x128xf32>
    %c0_3 = arith.constant 0 : index
    %c0_4 = arith.constant 0 : index
    %3 = vector.load %arg2[%c0_3, %c0_4] : memref<8x1xf32, #tpu.memory_space<vmem>>, vector<8x1xf32>
    %4 = vector.broadcast %3 : vector<8x1xf32> to vector<8x128xf32>
    %5 = arith.addf %2, %4 : vector<8x128xf32>
    %c0_5 = arith.constant 0 : index
    %c0_6 = arith.constant 0 : index
    %6 = vector.load %arg3[%c0_5, %c0_6] : memref<8x128xf32, #tpu.memory_space<vmem>>, vector<8x128xf32>
    tpu.vector_store %arg3[%c0_5, %c0_6], %5 {strides = array<i32>} : memref<8x128xf32, #tpu.memory_space<vmem>>, vector<8x128xf32>,
    return
  }
}

</mosaic_0001>

<bundles_post_ra>
// kernel: model_forward.1
= control target key start
LH: loop header
LB: loop body
LE: loop exit
PB: predicated region body
PF: predicated region fallthrough
CT: control target
= control target key end

     0   :  { %v64_v2 = vmov 0   ;;  %s142_s1 = inlined_call_operand.vmem [shape: f32[128,128], index: 1, kind: input, shape index: {}]   ;;  %s143_s2 = inlined_call_operand.vmem [shape: f32[8,1], index: 2, kind: input, shape index: {}]   ;;  %s144_s0 = inlined_call_operand.vmem [shape: f32[8,128], index: 0, kind: input, shape index: {}]   ;;  %s145_s3 = inlined_call_operand.vmem [shape: f32[8,128], index: 3, kind: output, shape index: {}]  }
   0x1   :  { %v30_v0 = vld [vmem:[%s142_s1 + $0x78] sm:$0xff]  ;;  %v29_v1 = vld [vmem:[%s142_s1 + $0x70] sm:$0xff]  ;;  %63 = vset.pattern.permute.xlu0 %v64_v2  ;;  %v28_v3 = vld [vmem:[%s142_s1 + $0x68] sm:$0xff] }
   0x2   :  { %37 = vmatpush.msra.mxu0 %v30_v0  ;;  %v27_v4 = vld [vmem:[%s142_s1 + $0x60] sm:$0xff]  ;;  %v26_v6 = vld [vmem:[%s142_s1 + $0x58] sm:$0xff]  ;;  %v25_v7 = vld [vmem:[%s142_s1 + $0x50] sm:$0xff] }
   0x3   :  { %v31_v5 = vld [vmem:[%s143_s2] sm:$0xff]  ;;  %v24_v8 = vld [vmem:[%s142_s1 + $0x48] sm:$0xff]  ;;  %v22_v10 = vld [vmem:[%s142_s1 + $0x38] sm:$0xff] }
   0x4   :  { %38 = vmatpush.msra.mxu0 %v29_v1  ;;  %34 = vperm.xlu0 %63, %v31_v5   ;;  %v23_v9 = vld [vmem:[%s142_s1 + $0x40] sm:$0xff]  ;;  %v21_v11 = vld [vmem:[%s142_s1 + $0x30] sm:$0xff]  ;;  %v20_v12 = vld [vmem:[%s142_s1 + $0x28] sm:$0xff] }
   0x5   :  { %v19_v13 = vld [vmem:[%s142_s1 + $0x20] sm:$0xff]  ;;  %v18_v14 = vld [vmem:[%s142_s1 + $0x18] sm:$0xff]  ;;  %v17_v15 = vld [vmem:[%s142_s1 + $0x10] sm:$0xff] }
   0x6   :  { %39 = vmatpush.msra.mxu0 %v28_v3  ;;  %v16_v16 = vld [vmem:[%s142_s1 + $0x8] sm:$0xff]  ;;  %v15_v17 = vld [vmem:[%s142_s1] sm:$0xff] }
   0x7   :  { %v14_v18 = vld [vmem:[%s144_s0] sm:$0xff] }
   0x8   :  { %40 = vmatpush.msra.mxu0 %v27_v4 }
   0xa   :  { %41 = vmatpush.msra.mxu0 %v26_v6 }
   0xc   :  { %42 = vmatpush.msra.mxu0 %v25_v7 }
   0xe   :  { %43 = vmatpush.msra.mxu0 %v24_v8 }
  0x10   :  { %44 = vmatpush.msra.mxu0 %v23_v9 }
  0x12   :  { %45 = vmatpush.msra.mxu0 %v22_v10 }
  0x14   :  { %46 = vmatpush.msra.mxu0 %v21_v11 }
  0x16   :  { %47 = vmatpush.msra.mxu0 %v20_v12 }
  0x18   :  { %48 = vmatpush.msra.mxu0 %v19_v13 }
  0x1a   :  { %49 = vmatpush.msra.mxu0 %v18_v14 }
  0x1c   :  { %50 = vmatpush.msra.mxu0 %v17_v15 }
  0x1e   :  { %51 = vmatpush.msra.mxu0 %v16_v16 }
  0x20   :  { %52 = vmatpush.msra.mxu0 %v15_v17 }
  0x21   :  { %53 = vmatmul.f32.vlgmr.msra.gmra.mxu0 %v14_v18 }
  0x76   :  { %v35_v19 = vpop.permute.xlu0 %34 }
  0x9e   :  { %v54_v20 = vpop.f32.mrf.mxu0 }
  0x9f   :  { %v55_v21 = vadd.f32 %v54_v20, %v35_v19 }
  0xa1   :  { %57 = vst [vmem:[%s145_s3] sm:$0xff] %v55_v21 }

</bundles_post_ra>
